<compile_context>
chip_gen: v5e
topology: v5e:2x2
jax: 0.10.0
libtpu: 0.0.40
codegen_flags: <defaults>
</compile_context>

<pallas_src>
import functools

import jax
import jax.numpy as jnp
import numpy as np
from jax.experimental import pallas as pl
from jax.experimental.pallas import tpu as pltpu


def _ifft2_real_kernel(s_ref, b1_ref, b2_ref, o_ref):
    # s_ref : (2H, G*W)     rows = [Re(h=0..H-1); Im(h=0..H-1)], cols = (c, w)
    # b1_ref: (2H, 2H)      [[cos, -sin], [sin, cos]] / H   (inverse DFT along H)
    # b2_ref: (2*G*W, G*W)  [[kron(I_G, cos)], [-kron(I_G, sin)]] / W
    # o_ref : (H, G*W)      real part of the 2D inverse FFT, cols = (c, n)
    H = o_ref.shape[0]

    # Stage 1: inverse DFT along H; real+imag fused in one 2D GEMM.
    t = jnp.dot(b1_ref[...].astype(s_ref.dtype), s_ref[...],
                preferred_element_type=jnp.float32,
                precision=jax.lax.Precision.HIGHEST)           # (2H, G*W)

    # Stage 2: inverse DFT along W, keeping only the real part.  Column-stack
    # the real / imag halves (sublane slice + lane concat, both cheap) so the
    # whole stage is one GEMM with K = 2*G*W and a lane-dense G*W-wide output.
    a = jnp.concatenate([t[:H, :], t[H:, :]], axis=1)          # (H, 2*G*W)
    y = jnp.dot(a.astype(b2_ref.dtype), b2_ref[...],
                preferred_element_type=jnp.float32,
                precision=jax.lax.Precision.HIGHEST)           # (H, G*W)
    o_ref[...] = y.astype(o_ref.dtype)


def _stage1_matrix(H: int) -> np.ndarray:
    # Fused complex inverse-DFT along H: [[cos, -sin], [sin, cos]] / H.
    k = np.arange(H)
    ang = 2.0 * np.pi * np.outer(k, k) / H
    ch = np.cos(ang) / H
    sh = np.sin(ang) / H
    return np.block([[ch, -sh], [sh, ch]]).astype(np.float32)   # (2H, 2H)


def _stage2_matrix(W: int, G: int) -> np.ndarray:
    # Real part of the inverse DFT along W, block-diagonal over G channels:
    # [[kron(I_G, cos)], [-kron(I_G, sin)]] / W   (cos/sin matrices symmetric).
    k = np.arange(W)
    ang = 2.0 * np.pi * np.outer(k, k) / W
    cw = np.cos(ang) / W
    sw = np.sin(ang) / W
    eye = np.eye(G)
    return np.concatenate([np.kron(eye, cw), -np.kron(eye, sw)],
                          axis=0).astype(np.float32)            # (2*G*W, G*W)


def _pick_channel_group(C: int, H: int, W: int) -> int:
    """How many channels to fold into the lane axis per grid step."""
    if C * W <= 1024:              # small case: single block, grid of 1
        return C
    for g in range(C, 0, -1):      # else a divisor with a 128-multiple lane tile
        if C % g == 0 and g * W <= 1024 and (g * W) % 128 == 0 and H % 4 == 0:
            return g
    return C                       # fallback: full-extent block (always legal)


@functools.partial(jax.jit, static_argnames=("compute_dtype",))
def ifft_forward(x, compute_dtype=jnp.float32):
    """x: (2, C, H, W) or (1, 2, C, H, W) float32 -> (1, C, H, W) float32."""
    if x.ndim == 5:
        x = jnp.squeeze(x, axis=0)
    assert x.ndim == 4 and x.shape[0] == 2, "expected (2, C, H, W)"
    _, C, H, W = x.shape

    G = _pick_channel_group(C, H, W)
    num_groups = C // G
    gw = G * W

    # Single stacked operand [Xr; Xi], rows (part, h), cols (c, w): (2H, C*W).
    s = jnp.transpose(x, (0, 2, 1, 3)).reshape(2 * H, C * W).astype(compute_dtype)
    b1 = jnp.asarray(_stage1_matrix(H), dtype=compute_dtype)
    b2 = jnp.asarray(_stage2_matrix(W, G), dtype=compute_dtype)

    # VMEM budget: double-buffered blocks + basis matrices + intermediates.
    # Only pass an explicit limit when the working set is large so small cases
    # keep the conservative per-generation defaults (16/32 MiB scoped).
    itemsize = jnp.dtype(compute_dtype).itemsize
    vmem_need = itemsize * (2 * (2 * H * gw)        # spectrum block (x2 buf)
                            + 2 * (2 * H) ** 2      # B1
                            + 2 * (2 * gw * gw))    # B2
    vmem_need += 4 * (2 * (H * gw)                  # output block (x2 buf)
                      + (2 * H * gw)                # stage-1 result
                      + (2 * H * gw) + (H * gw))    # concat + stage-2 result
    cp_kwargs = dict(dimension_semantics=("parallel",))
    if vmem_need > 12 * 1024 * 1024:
        cp_kwargs["vmem_limit_bytes"] = int(min(vmem_need * 3 // 2,
                                                100 * 1024 * 1024))

    out = pl.pallas_call(
        _ifft2_real_kernel,
        out_shape=jax.ShapeDtypeStruct((H, C * W), jnp.float32),
        grid=(num_groups,),
        in_specs=[
            pl.BlockSpec((2 * H, gw), lambda g: (0, g)),      # spectrum group
            pl.BlockSpec((2 * H, 2 * H), lambda g: (0, 0)),   # constant basis (H)
            pl.BlockSpec((2 * gw, gw), lambda g: (0, 0)),     # constant basis (W)
        ],
        out_specs=pl.BlockSpec((H, gw), lambda g: (0, g)),
        compiler_params=pltpu.CompilerParams(**cp_kwargs),
    )(s, b1, b2)

    # (H, C*W) -> (1, C, H, W)
    return jnp.transpose(out.reshape(H, C, W), (1, 0, 2))[None]


if __name__ == "__main__":
    key = jax.random.PRNGKey(0)
    # (2, C, H, W): real/imag planes of a C-channel 2D spectrum
    x = jax.random.normal(key, (2, 4, 16, 16), dtype=jnp.float32)

    y = ifft_forward(x)
    y = jax.block_until_ready(y)

    # reference: real part of complex ifft2 == torch.irfft(..., onesided=False)
    ref = jnp.fft.ifft2(x[0] + 1j * x[1], axes=(-2, -1)).real[None]
    assert y.shape == (1, 4, 16, 16)
    np.testing.assert_allclose(np.asarray(y), np.asarray(ref),
                               atol=2e-5, rtol=2e-5)

    print("KERNEL_OK")
</pallas_src>

<mosaic_0001>
module attributes {stable_mosaic.version = 11 : i64} {
  func.func @_ifft2_real_kernel(%arg0: i32, %arg1: memref<32x64xf32, #tpu.memory_space<vmem>>, %arg2: memref<32x32xf32, #tpu.memory_space<vmem>>, %arg3: memref<128x64xf32, #tpu.memory_space<vmem>>, %arg4: memref<16x64xf32, #tpu.memory_space<vmem>>) attributes {dimension_semantics = [#tpu.dimension_semantics<parallel>], iteration_bounds = array<i64: 1>, scalar_prefetch = 0 : i64, scratch_operands = 0 : i64, tpu.core_type = #tpu.core_type<tc>, window_params = [{transform_indices = @transform_0, window_bounds = array<i64: 32, 64>}, {pipeline_mode = #tpu.pipeline_mode<synchronous>, transform_indices = @transform_1, window_bounds = array<i64: 32, 32>}, {pipeline_mode = #tpu.pipeline_mode<synchronous>, transform_indices = @transform_2, window_bounds = array<i64: 128, 64>}, {transform_indices = @transform_3, window_bounds = array<i64: 16, 64>}]} {
    %c0 = arith.constant 0 : index
    %c0_0 = arith.constant 0 : index
    %0 = vector.load %arg2[%c0, %c0_0] : memref<32x32xf32, #tpu.memory_space<vmem>>, vector<32x32xf32>
    %c0_1 = arith.constant 0 : index
    %c0_2 = arith.constant 0 : index
    %1 = vector.load %arg1[%c0_1, %c0_2] : memref<32x64xf32, #tpu.memory_space<vmem>>, vector<32x64xf32>
    %cst = arith.constant dense<0.000000e+00> : vector<32x64xf32>
    %2 = tpu.matmul %0, %1, %cst {dimension_numbers = #tpu.dot_dimension_numbers<[1], [0], [0], [1], [0, 0, 1, 1], [], []>, precision = #tpu.contract_precision<fp32>} : vector<32x32xf32>, vector<32x64xf32>, vector<32x64xf32> -> vector<32x64xf32>
    %3 = vector.extract_strided_slice %2 {offsets = [0, 0], sizes = [16, 64], strides = [1, 1]} : vector<32x64xf32> to vector<16x64xf32>
    %4 = vector.extract_strided_slice %2 {offsets = [16, 0], sizes = [16, 64], strides = [1, 1]} : vector<32x64xf32> to vector<16x64xf32>
    %5 = tpu.concatenate %3, %4 in 1 : vector<16x64xf32>, vector<16x64xf32> -> vector<16x128xf32>
    %c0_3 = arith.constant 0 : index
    %c0_4 = arith.constant 0 : index
    %6 = vector.load %arg3[%c0_3, %c0_4] : memref<128x64xf32, #tpu.memory_space<vmem>>, vector<128x64xf32>
    %cst_5 = arith.constant dense<0.000000e+00> : vector<16x64xf32>
    %7 = tpu.matmul %5, %6, %cst_5 {dimension_numbers = #tpu.dot_dimension_numbers<[1], [0], [0], [1], [0, 0, 1, 1], [], []>, precision = #tpu.contract_precision<fp32>} : vector<16x128xf32>, vector<128x64xf32>, vector<16x64xf32> -> vector<16x64xf32>
    %c0_6 = arith.constant 0 : index
    %c0_7 = arith.constant 0 : index
    %8 = vector.load %arg4[%c0_6, %c0_7] : memref<16x64xf32, #tpu.memory_space<vmem>>, vector<16x64xf32>
    tpu.vector_store %arg4[%c0_6, %c0_7], %7 {strides = array<i32>} : memref<16x64xf32, #tpu.memory_space<vmem>>, vector<16x64xf32>,
    return
  }
  func.func @transform_0(%arg0: i32) -> (i32, i32) {
    %c0_i32 = arith.constant 0 : i32
    %c0_i32_0 = arith.constant 0 : i32
    return %c0_i32, %arg0 : i32, i32
  }
  func.func @transform_1(%arg0: i32) -> (i32, i32) {
    %c0_i32 = arith.constant 0 : i32
    %c0_i32_0 = arith.constant 0 : i32
    %c0_i32_1 = arith.constant 0 : i32
    return %c0_i32, %c0_i32_0 : i32, i32
  }
  func.func @transform_2(%arg0: i32) -> (i32, i32) {
    %c0_i32 = arith.constant 0 : i32
    %c0_i32_0 = arith.constant 0 : i32
    %c0_i32_1 = arith.constant 0 : i32
    return %c0_i32, %c0_i32_0 : i32, i32
  }
  func.func @transform_3(%arg0: i32) -> (i32, i32) {
    %c0_i32 = arith.constant 0 : i32
    %c0_i32_0 = arith.constant 0 : i32
    return %c0_i32, %arg0 : i32, i32
  }
}

</mosaic_0001>

<bundles_post_ra>
// kernel: ifft_forward.1
= control target key start
LH: loop header
LB: loop body
LE: loop exit
PB: predicated region body
PF: predicated region fallthrough
CT: control target
= control target key end

     0   :  { %vm22_vm0 = vcmask 261120   ;;  %vm321_vm1 = vcmask 523264   ;;  %s1111_s0 = inlined_call_operand.vmem [shape: f32[32,64], index: 0, kind: input, shape index: {}]   ;;  %s1112_s1 = inlined_call_operand.vmem [shape: f32[32,32], index: 1, kind: input, shape index: {}]   ;;  %s1113_s2 = inlined_call_operand.vmem [shape: f32[128,64], index: 2, kind: input, shape index: {}]   ;;  %s1114_s3 = inlined_call_operand.vmem [shape: f32[16,64], index: 3, kind: output, shape index: {}]  }
   0x1   :  { %v21_v0 = vld [vmem:[%s1111_s0 + $0x18] sm:$0xff]  ;;  %v20_v1 = vld [vmem:[%s1111_s0 + $0x10] sm:$0xff]  ;;  %v19_v2 = vld [vmem:[%s1111_s0 + $0x8] sm:$0xff] }
   0x2   :  { %v749_v3 = vand.u32 4294901760, %v21_v0  ;;  %v751_v4 = vand.u32 4294901760, %v20_v1  ;;  %v753_v5 = vand.u32 4294901760, %v19_v2  ;;  %v18_v6 = vld [vmem:[%s1111_s0] sm:$0xff]  ;;  %v15_v8 = vld [vmem:[%s1112_s1 + $0x8] sm:$0xff]  ;;  %v16_v12 = vld [vmem:[%s1112_s1 + $0x10] sm:$0xff] }
   0x3   :  { %v14_v7 = vld [vmem:[%s1112_s1] sm:$0xff]  ;;  %v764_v9 = vand.u32 4294901760, %v18_v6  ;;  %v27_v11 = vsel %vm22_vm0, %v15_v8, 0  ;;  %v30_v19 = vsel %vm22_vm0, %v16_v12, 0  ;;  %v17_v38 = vld [vmem:[%s1112_s1 + $0x18] sm:$0xff]  ;;  %v338_v8 = vld [vmem:[%s1113_s2 + $0x70] sm:$0xff] }
   0x4   :  { %v24_v10 = vsel %vm22_vm0, %v14_v7, 0  ;;  %48 = vmatpush.msra.mxu0 %v749_v3  ;;  %v101_v13 = vsub.f32 %v21_v0, %v749_v3  ;;  %v107_v14 = vsub.f32 %v20_v1, %v751_v4  ;;  %199 = vmatpush.msra.mxu3 %v749_v3  ;;  %v113_v15 = vsub.f32 %v19_v2, %v753_v5  ;;  %v339_v7 = vld [vmem:[%s1113_s2 + $0x78] sm:$0xff] }
   0x5   :  { %v776_v16 = vand.u32 4294901760, %v24_v10  ;;  %v119_v17 = vsub.f32 %v18_v6, %v764_v9  ;;  %v779_v18 = vand.u32 4294901760, %v27_v11  ;;  %v71_v31 = vand.u32 4294901760, %v30_v19 }
   0x6   :  { %50 = vmatpush.msra.mxu0 %v751_v4  ;;  %155 = vmatpush.msra.mxu2 %v101_v13  ;;  %v102_v20 = vand.u32 4294901760, %v101_v13  ;;  %v108_v22 = vand.u32 4294901760, %v107_v14  ;;  %v114_v23 = vand.u32 4294901760, %v113_v15  ;;  %v33_v42 = vsel %vm22_vm0, %v17_v38, 0 }
   0x7   :  { %v56_v21 = vsub.f32 %v24_v10, %v776_v16  ;;  %201 = vmatpush.msra.mxu3 %v751_v4  ;;  %v120_v24 = vand.u32 4294901760, %v119_v17  ;;  %v64_v25 = vsub.f32 %v27_v11, %v779_v18  ;;  %v72_v41 = vsub.f32 %v30_v19, %v71_v31 }
   0x8   :  { %52 = vmatpush.msra.mxu0 %v753_v5  ;;  %158 = vmatpush.msra.mxu2 %v107_v14  ;;  %v103_v26 = vsub.f32 %v101_v13, %v102_v20  ;;  %v109_v28 = vsub.f32 %v107_v14, %v108_v22  ;;  %v115_v29 = vsub.f32 %v113_v15, %v114_v23  ;;  %v79_v45 = vand.u32 4294901760, %v33_v42  ;;  %v336_v14 = vld [vmem:[%s1113_s2 + $0x60] sm:$0xff] }
   0x9   :  { %v57_v27 = vand.u32 4294901760, %v56_v21  ;;  %203 = vmatpush.msra.mxu3 %v753_v5  ;;  %v121_v30 = vsub.f32 %v119_v17, %v120_v24  ;;  %v65_v35 = vand.u32 4294901760, %v64_v25  ;;  %v73_v44 = vand.u32 4294901760, %v72_v41 }
   0xa   :  { %54 = vmatpush.msra.mxu0 %v764_v9  ;;  %v104_v32 = vand.u32 4294901760, %v103_v26  ;;  %161 = vmatpush.msra.mxu2 %v113_v15  ;;  %v110_v34 = vand.u32 4294901760, %v109_v28  ;;  %v116_v37 = vand.u32 4294901760, %v115_v29  ;;  %v80_v47 = vsub.f32 %v33_v42, %v79_v45  ;;  %v335_v15 = vld [vmem:[%s1113_s2 + $0x58] sm:$0xff] }
   0xb   :  { %v58_v33 = vsub.f32 %v56_v21, %v57_v27  ;;  %205 = vmatpush.msra.mxu3 %v764_v9  ;;  %v122_v39 = vand.u32 4294901760, %v121_v30  ;;  %v66_v40 = vsub.f32 %v64_v25, %v65_v35  ;;  %v74_v46 = vsub.f32 %v72_v41, %v73_v44 }
   0xc   :  { %246 = vmatpush.msrb.mxu0 %v102_v20  ;;  %105 = vmatpush.msra.mxu1 %v104_v32  ;;  %v81_v49 = vand.u32 4294901760, %v80_v47  ;;  %v819_v11 = vand.u32 4294901760, %v339_v7  ;;  %v821_v12 = vand.u32 4294901760, %v338_v8  ;;  %v333_v20 = vld [vmem:[%s1113_s2 + $0x48] sm:$0xff] }
   0xd   :  { %v59_v36 = vand.u32 4294901760, %v58_v33  ;;  %164 = vmatpush.msra.mxu2 %v119_v17  ;;  %209 = vmatmul.f32.vlgmr.msra.gmra.mxu3 %v57_v27  ;;  %v67_v43 = vand.u32 4294901760, %v66_v40  ;;  %v75_v48 = vand.u32 4294901760, %v74_v46  ;;  %v834_v17 = vand.u32 4294901760, %v336_v14  ;;  %v329_v46 = vld [vmem:[%s1113_s2 + $0x28] sm:$0xff] }
   0xe   :  { %167 = vmatmul.f32.vlgmr.msra.gmra.mxu2 %v56_v21  ;;  %111 = vmatpush.msra.mxu1 %v110_v34  ;;  %v82_v50 = vsub.f32 %v80_v47, %v81_v49  ;;  %v332_v21 = vld [vmem:[%s1113_s2 + $0x40] sm:$0xff] }
   0xf   :  { %60 = vmatmul.f32.vlgmr.msra.gmra.mxu0 %v59_v36  ;;  %341 = vmatpush.msrb.mxu2 %v819_v11  ;;  %v860_v26 = vsub.f32 %v336_v14, %v834_v17  ;;  %v868_v29 = vand.u32 4294901760, %v332_v21 }
  0x10   :  { %250 = vmatpush.msrb.mxu0 %v108_v22  ;;  %117 = vmatpush.msra.mxu1 %v116_v37  ;;  %v83_v51 = vand.u32 4294901760, %v82_v50  ;;  %v847_v22 = vsub.f32 %v339_v7, %v819_v11 }
  0x11   :  { %343 = vmatpush.msrb.mxu2 %v821_v12 }
  0x12   :  { %254 = vmatpush.msrb.mxu0 %v114_v23  ;;  %123 = vmatpush.msra.mxu1 %v122_v39  ;;  %v850_v23 = vsub.f32 %v338_v8, %v821_v12 }
  0x13   :  { %125 = vmatmul.f32.vlgmr.msra.gmra.mxu1 %v776_v16 }
  0x14   :  { %258 = vmatpush.msrb.mxu0 %v120_v24  ;;  %289 = vmatpush.msrb.mxu1 %v749_v3  ;;  %v397_v32 = vand.u32 4294901760, %v850_v23 }
  0x15   :  { %215 = vmatmul.f32.gmra.mxu3 %v65_v35  ;;  %v409_v35 = vand.u32 4294901760, %v860_v26 }
  0x16   :  { %172 = vmatmul.f32.gmra.mxu2 %v64_v25  ;;  %291 = vmatpush.msrb.mxu1 %v751_v4  ;;  %v856_v25 = vand.u32 4294901760, %v333_v20  ;;  %v398_v39 = vsub.f32 %v850_v23, %v397_v32 }
  0x17   :  { %68 = vmatmul.f32.gmra.mxu0 %v67_v43  ;;  %v896_v43 = vsub.f32 %v332_v21, %v868_v29 }
  0x18   :  { %293 = vmatpush.msrb.mxu1 %v753_v5  ;;  %496 = vmatpush.msra.mxu0 %v847_v22  ;;  %v880_v37 = vsub.f32 %v333_v20, %v856_v25  ;;  %v399_v50 = vand.u32 4294901760, %v398_v39 }
  0x1a   :  { %295 = vmatpush.msrb.mxu1 %v764_v9  ;;  %v337_v9 = vld [vmem:[%s1113_s2 + $0x68] sm:$0xff]  ;;  %499 = vmatpush.msra.mxu0 %v850_v23 }
  0x1b   :  { %129 = vmatmul.f32.gmra.mxu1 %v779_v18  ;;  %v823_v13 = vand.u32 4294901760, %v337_v9 }
  0x1c   :  { %554 = vmatpush.msra.mxu1 %v819_v11 }
  0x1d   :  { %221 = vmatmul.f32.gmra.mxu3 %v73_v44  ;;  %v853_v24 = vsub.f32 %v337_v9, %v823_v13  ;;  %345 = vmatpush.msrb.mxu2 %v823_v13  ;;  %v331_v44 = vld [vmem:[%s1113_s2 + $0x38] sm:$0xff] }
  0x1e   :  { %177 = vmatmul.f32.gmra.mxu2 %v72_v41  ;;  %556 = vmatpush.msra.mxu1 %v821_v12 }
  0x1f   :  { %76 = vmatmul.f32.gmra.mxu0 %v75_v48  ;;  %v403_v33 = vand.u32 4294901760, %v853_v24  ;;  %347 = vmatpush.msrb.mxu2 %v834_v17 }
  0x20   :  { %558 = vmatpush.msra.mxu1 %v823_v13  ;;  %502 = vmatpush.msra.mxu0 %v853_v24 }
  0x21   :  { %v404_v40 = vsub.f32 %v853_v24, %v403_v33 }
  0x22   :  { %560 = vmatpush.msra.mxu1 %v834_v17  ;;  %505 = vmatpush.msra.mxu0 %v860_v26 }
  0x23   :  { %133 = vmatmul.f32.gmra.mxu1 %v71_v31 }
  0x25   :  { %227 = vmatmul.f32.gmra.mxu3 %v81_v49 }
  0x26   :  { %182 = vmatmul.f32.gmra.mxu2 %v80_v47 }
  0x27   :  { %84 = vmatmul.f32.gmra.mxu0 %v83_v51  ;;  %v410_v51 = vsub.f32 %v860_v26, %v409_v35 }
  0x2b   :  { %137 = vmatmul.f32.gmra.mxu1 %v79_v45 }
  0x2f   :  { %260 = vmatmul.f32.vlgmr.msrb.gmra.mxu0 %v776_v16 }
  0x33   :  { %297 = vmatmul.f32.vlgmr.msrb.gmra.mxu1 %v776_v16  ;;  %v334_v16 = vld [vmem:[%s1113_s2 + $0x50] sm:$0xff] }
  0x34   :  { %v838_v19 = vand.u32 4294901760, %v334_v16 }
  0x36   :  { %v866_v28 = vsub.f32 %v334_v16, %v838_v19 }
  0x37   :  { %264 = vmatmul.f32.gmra.mxu0 %v779_v18 }
  0x38   :  { %v421_v42 = vand.u32 4294901760, %v866_v28 }
  0x3b   :  { %301 = vmatmul.f32.gmra.mxu1 %v779_v18  ;;  %v836_v18 = vand.u32 4294901760, %v335_v15 }
  0x3d   :  { %v863_v27 = vsub.f32 %v335_v15, %v836_v18  ;;  %349 = vmatpush.msrb.mxu2 %v836_v18  ;;  %562 = vmatpush.msra.mxu1 %v836_v18 }
  0x3f   :  { %268 = vmatmul.f32.gmra.mxu0 %v71_v31  ;;  %v415_v36 = vand.u32 4294901760, %v863_v27  ;;  %351 = vmatpush.msrb.mxu2 %v838_v19 }
  0x40   :  { %508 = vmatpush.msra.mxu0 %v863_v27  ;;  %564 = vmatpush.msra.mxu1 %v838_v19 }
  0x41   :  { %353 = vmatpush.msrb.mxu2 %v856_v25 }
  0x42   :  { %511 = vmatpush.msra.mxu0 %v866_v28  ;;  %566 = vmatpush.msra.mxu1 %v856_v25 }
  0x43   :  { %305 = vmatmul.f32.gmra.mxu1 %v71_v31  ;;  %v391_v31 = vand.u32 4294901760, %v847_v22  ;;  %355 = vmatpush.msrb.mxu2 %v868_v29 }
  0x44   :  { %514 = vmatpush.msra.mxu0 %v880_v37  ;;  %568 = vmatpush.msra.mxu1 %v868_v29 }
  0x45   :  { %v392_v38 = vsub.f32 %v847_v22, %v391_v31 }
  0x46   :  { %517 = vmatpush.msra.mxu0 %v896_v43 }
  0x47   :  { %272 = vmatmul.f32.gmra.mxu0 %v79_v45  ;;  %v393_v49 = vand.u32 4294901760, %v392_v38  ;;  %v325_v38 = vld [vmem:[%s1113_s2 + $0x8] sm:$0xff] }
  0x49   :  { %394 = vmatpush.msrb.mxu3 %v393_v49 }
  0x4b   :  { %309 = vmatmul.f32.gmra.mxu1 %v79_v45  ;;  %v330_v45 = vld [vmem:[%s1113_s2 + $0x30] sm:$0xff]  ;;  %400 = vmatpush.msrb.mxu3 %v399_v50 }
  0x8c   :  { %v61_v52 = vpop.f32.mrf.mxu0 }
  0x90   :  { %v126_v53 = vpop.f32.mrf.mxu1  ;;  %v210_v56 = vpop.f32.mrf.mxu3 }
  0x91   :  { %v168_v54 = vpop.f32.mrf.mxu2  ;;  %v127_v55 = vadd.f32 %v126_v53, %v61_v52  ;;  %v416_v53 = vsub.f32 %v863_v27, %v415_v36 }
  0x93   :  { %v169_v58 = vadd.f32 %v168_v54, %v127_v55  ;;  %v427_v54 = vand.u32 4294901760, %v880_v37  ;;  %v328_v55 = vld [vmem:[%s1113_s2 + $0x20] sm:$0xff]  ;;  %v417_v14 = vand.u32 4294901760, %v416_v53 }
  0x94   :  { %v69_v57 = vpop.f32.mrf.mxu0 }
  0x95   :  { %v211_v59 = vadd.f32 %v210_v56, %v169_v58  ;;  %v405_v56 = vand.u32 4294901760, %v404_v40  ;;  %v925_v58 = vand.u32 4294901760, %v330_v45  ;;  %v428_v9 = vsub.f32 %v880_v37, %v427_v54 }
  0x97   :  { %406 = vmatpush.msrb.mxu3 %v405_v56 }
  0x98   :  { %v130_v60 = vpop.f32.mrf.mxu1  ;;  %v216_v63 = vpop.f32.mrf.mxu3 }
  0x99   :  { %v173_v61 = vpop.f32.mrf.mxu2  ;;  %v131_v62 = vadd.f32 %v130_v60, %v69_v57  ;;  %v923_v57 = vand.u32 4294901760, %v331_v44  ;;  %v422_v60 = vsub.f32 %v866_v28, %v421_v42 }
  0x9b   :  { %v174_v1 = vadd.f32 %v173_v61, %v131_v62  ;;  %v433_v61 = vand.u32 4294901760, %v896_v43  ;;  %v327_v62 = vld [vmem:[%s1113_s2 + $0x18] sm:$0xff]  ;;  %v423_v39 = vand.u32 4294901760, %v422_v60  ;;  %357 = vmatpush.msrb.mxu2 %v923_v57  ;;  %570 = vmatpush.msra.mxu1 %v923_v57 }
  0x9c   :  { %v804_v0 = vpop.f32.mrf.mxu0  ;;  %v961_v20 = vand.u32 4294901760, %v327_v62 }
  0x9d   :  { %v217_v2 = vadd.f32 %v216_v63, %v174_v1  ;;  %v411_v1 = vand.u32 4294901760, %v410_v51  ;;  %359 = vmatpush.msrb.mxu2 %v925_v58  ;;  %572 = vmatpush.msra.mxu1 %v925_v58 }
  0x9f   :  { %412 = vmatpush.msrb.mxu3 %v411_v1 }
  0xa0   :  { %v134_v3 = vpop.f32.mrf.mxu1  ;;  %v222_v63 = vpop.f32.mrf.mxu3 }
  0xa1   :  { %v178_v47 = vpop.f32.mrf.mxu2  ;;  %v135_v52 = vadd.f32 %v134_v3, %v804_v0  ;;  %v943_v3 = vsub.f32 %v330_v45, %v925_v58  ;;  %418 = vmatpush.msrb.mxu3 %v417_v14 }
  0xa3   :  { %v179_v7 = vadd.f32 %v178_v47, %v135_v52  ;;  %v445_v40 = vand.u32 4294901760, %v943_v3  ;;  %v429_v47 = vand.u32 4294901760, %v428_v9  ;;  %424 = vmatpush.msrb.mxu3 %v423_v39 }
  0xa4   :  { %v806_v4 = vpop.f32.mrf.mxu0 }
  0xa5   :  { %v223_v45 = vadd.f32 %v222_v63, %v179_v7  ;;  %v446_v56 = vsub.f32 %v943_v3, %v445_v40  ;;  %430 = vmatpush.msrb.mxu3 %v429_v47 }
  0xa7   :  { %v447_v39 = vand.u32 4294901760, %v446_v56 }
  0xa8   :  { %v808_v5 = vpop.f32.mrf.mxu1  ;;  %v228_v7 = vpop.f32.mrf.mxu3 }
  0xa9   :  { %v183_v49 = vpop.f32.mrf.mxu2 }
  0xac   :  { %v261_v6 = vpop.f32.mrf.mxu0 }
  0xad   :  { %v262_v10 = vadd.f32 %v261_v6, %v211_v59  ;;  %v927_v59 = vand.u32 4294901760, %v329_v46  ;;  %v945_v6 = vand.u32 4294901760, %v328_v55 }
  0xaf   :  { %v959_v16 = vsub.f32 %v329_v46, %v927_v59  ;;  %v139_v46 = vadd.f32 %v808_v5, %v806_v4  ;;  %v991_v4 = vsub.f32 %v327_v62, %v961_v20  ;;  %v993_v5 = vand.u32 4294901760, %v325_v38  ;;  %361 = vmatpush.msrb.mxu2 %v927_v59  ;;  %574 = vmatpush.msra.mxu1 %v927_v59 }
  0xb0   :  { %v298_v30 = vpop.f32.mrf.mxu1 }
  0xb1   :  { %v875_v34 = vadd.f32 %v298_v30, %v262_v10  ;;  %v326_v10 = vld [vmem:[%s1113_s2 + $0x10] sm:$0xff]  ;;  %v434_v30 = vsub.f32 %v896_v43, %v433_v61  ;;  %v451_v51 = vand.u32 4294901760, %v959_v16  ;;  %363 = vmatpush.msrb.mxu2 %v945_v6  ;;  %576 = vmatpush.msra.mxu1 %v945_v6 }
  0xb3   :  { %v435_v53 = vand.u32 4294901760, %v434_v30  ;;  %v452_v14 = vsub.f32 %v959_v16, %v451_v51  ;;  %365 = vmatpush.msrb.mxu2 %v961_v20  ;;  %578 = vmatpush.msra.mxu1 %v961_v20 }
  0xb4   :  { %v265_v41 = vpop.f32.mrf.mxu0 }
  0xb5   :  { %v266_v48 = vadd.f32 %v265_v41, %v217_v2  ;;  %v939_v2 = vsub.f32 %v331_v44, %v923_v57  ;;  %v974_v41 = vsub.f32 %v328_v55, %v945_v6  ;;  %v976_v44 = vand.u32 4294901760, %v326_v10  ;;  %436 = vmatpush.msrb.mxu3 %v435_v53 }
  0xb7   :  { %v439_v15 = vand.u32 4294901760, %v939_v2  ;;  %v457_v60 = vand.u32 4294901760, %v974_v41  ;;  %v1003_v62 = vsub.f32 %v326_v10, %v976_v44  ;;  %520 = vmatpush.msra.mxu0 %v939_v2  ;;  %v1015_v10 = vsub.f32 %v325_v38, %v993_v5  ;;  %367 = vmatpush.msrb.mxu2 %v976_v44 }
  0xb8   :  { %v302_v0 = vpop.f32.mrf.mxu1  ;;  %580 = vmatpush.msra.mxu1 %v976_v44 }
  0xb9   :  { %v947_v8 = vadd.f32 %v302_v0, %v266_v48  ;;  %v324_v48 = vld [vmem:[%s1113_s2] sm:$0xff]  ;;  %v440_v50 = vsub.f32 %v939_v2, %v439_v15  ;;  %v184_v0 = vadd.f32 %v183_v49, %v139_v46  ;;  %s719_s2 = smov 64   ;;  %523 = vmatpush.msra.mxu0 %v943_v3  ;;  %v469_v46 = vand.u32 4294901760, %v1003_v62  ;;  %369 = vmatpush.msrb.mxu2 %v993_v5 }
  0xba   :  { %v1005_v63 = vand.u32 4294901760, %v324_v48  ;;  %v453_v49 = vand.u32 4294901760, %v452_v14  ;;  %582 = vmatpush.msra.mxu1 %v993_v5 }
  0xbb   :  { %v441_v9 = vand.u32 4294901760, %v440_v50  ;;  %v229_v38 = vadd.f32 %v228_v7, %v184_v0  ;;  %526 = vmatpush.msra.mxu0 %v959_v16  ;;  %v470_v56 = vsub.f32 %v1003_v62, %v469_v46 }
  0xbc   :  { %v269_v21 = vpop.f32.mrf.mxu0  ;;  %v1025_v47 = vsub.f32 %v324_v48, %v1005_v63  ;;  %371 = vmatpush.msrb.mxu2 %v1005_v63  ;;  %584 = vmatpush.msra.mxu1 %v1005_v63 }
  0xbd   :  { %v270_v52 = vadd.f32 %v269_v21, %v223_v45  ;;  %v463_v21 = vand.u32 4294901760, %v991_v4  ;;  %v458_v45 = vsub.f32 %v974_v41, %v457_v60  ;;  %442 = vmatpush.msrb.mxu3 %v441_v9  ;;  %529 = vmatpush.msra.mxu0 %v974_v41  ;;  %v471_v14 = vand.u32 4294901760, %v470_v56 }
  0xbe   :  { %v481_v0 = vand.u32 4294901760, %v1025_v47  ;;  %601 = vmatpush.msra.mxu2 %v391_v31 }
  0xbf   :  { %v464_v50 = vsub.f32 %v991_v4, %v463_v21  ;;  %448 = vmatpush.msrb.mxu3 %v447_v39  ;;  %532 = vmatpush.msra.mxu0 %v991_v4 }
  0xc0   :  { %v306_v55 = vpop.f32.mrf.mxu1  ;;  %605 = vmatpush.msra.mxu2 %v397_v32 }
  0xc1   :  { %v307_v1 = vadd.f32 %v306_v55, %v270_v52  ;;  %v475_v52 = vand.u32 4294901760, %v1015_v10  ;;  %v459_v55 = vand.u32 4294901760, %v458_v45  ;;  %454 = vmatpush.msrb.mxu3 %v453_v49  ;;  %v465_v7 = vand.u32 4294901760, %v464_v50  ;;  %535 = vmatpush.msra.mxu0 %v1003_v62 }
  0xc2   :  { %609 = vmatpush.msra.mxu2 %v403_v33 }
  0xc3   :  { %315 = vrot.lane.b32.xlu0 %v307_v1, %s719_s2  ;;  %v476_v9 = vsub.f32 %v1015_v10, %v475_v52  ;;  %460 = vmatpush.msrb.mxu3 %v459_v55 }
  0xc4   :  { %v273_v30 = vpop.f32.mrf.mxu0  ;;  %538 = vmatpush.msra.mxu0 %v1015_v10  ;;  %613 = vmatpush.msra.mxu2 %v409_v35 }
  0xc5   :  { %v274_v53 = vadd.f32 %v273_v30, %v229_v38  ;;  %v482_v30 = vsub.f32 %v1025_v47, %v481_v0  ;;  %466 = vmatpush.msrb.mxu3 %v465_v7  ;;  %v477_v39 = vand.u32 4294901760, %v476_v9 }
  0xc6   :  { %541 = vmatpush.msra.mxu0 %v1025_v47  ;;  %617 = vmatpush.msra.mxu2 %v415_v36 }
  0xc7   :  { %472 = vmatpush.msrb.mxu3 %v471_v14  ;;  %v483_v45 = vand.u32 4294901760, %v482_v30 }
  0xc8   :  { %v310_v48 = vpop.f32.mrf.mxu1  ;;  %621 = vmatpush.msra.mxu2 %v421_v42 }
  0xc9   :  { %v311_v1 = vadd.f32 %v310_v48, %v274_v53  ;;  %478 = vmatpush.msrb.mxu3 %v477_v39 }
  0xca   :  { %625 = vmatpush.msra.mxu2 %v427_v54 }
  0xcb   :  { %317 = vrot.lane.b32.xlu0 %v311_v1, %s719_s2  ;;  %484 = vmatpush.msrb.mxu3 %v483_v45 }
  0xcc   :  { %629 = vmatpush.msra.mxu2 %v433_v61 }
  0xcd   :  { %672 = vmatpush.msra.mxu3 %v819_v11 }
  0xce   :  { %633 = vmatpush.msra.mxu2 %v439_v15 }
  0xcf   :  { %674 = vmatpush.msra.mxu3 %v821_v12 }
  0xd0   :  { %637 = vmatpush.msra.mxu2 %v445_v40 }
  0xd1   :  { %676 = vmatpush.msra.mxu3 %v823_v13 }
  0xd2   :  { %641 = vmatpush.msra.mxu2 %v451_v51 }
  0xd3   :  { %678 = vmatpush.msra.mxu3 %v834_v17 }
  0xd4   :  { %645 = vmatpush.msra.mxu2 %v457_v60 }
  0xd5   :  { %680 = vmatpush.msra.mxu3 %v836_v18 }
  0xd6   :  { %649 = vmatpush.msra.mxu2 %v463_v21 }
  0xd7   :  { %682 = vmatpush.msra.mxu3 %v838_v19 }
  0xd8   :  { %653 = vmatpush.msra.mxu2 %v469_v46 }
  0xd9   :  { %684 = vmatpush.msra.mxu3 %v856_v25 }
  0xda   :  { %657 = vmatpush.msra.mxu2 %v475_v52 }
  0xdb   :  { %686 = vmatpush.msra.mxu3 %v868_v29 }
  0xdc   :  { %661 = vmatpush.msra.mxu2 %v481_v0 }
  0xdd   :  { %688 = vmatpush.msra.mxu3 %v923_v57 }
  0xdf   :  { %690 = vmatpush.msra.mxu3 %v925_v58 }
  0xe1   :  { %692 = vmatpush.msra.mxu3 %v927_v59 }
  0xe3   :  { %694 = vmatpush.msra.mxu3 %v945_v6 }
  0xe5   :  { %696 = vmatpush.msra.mxu3 %v961_v20 }
  0xe7   :  { %698 = vmatpush.msra.mxu3 %v976_v44 }
  0xe9   :  { %700 = vmatpush.msra.mxu3 %v993_v5 }
  0xeb   :  { %702 = vmatpush.msra.mxu3 %v1005_v63 }
 0x135   :  { %v316_v11 = vpop.permute.xlu0 %315 }
 0x136   :  { %v322_v12 = vsel %vm321_vm1, %v875_v34, %v316_v11 }
 0x137   :  { %v372_v13 = vand.u32 4294901760, %v322_v12 }
 0x139   :  { %v373_v17 = vsub.f32 %v322_v12, %v372_v13  ;;  %486 = vmatmul.f32.vlgmr.msrb.gmra.mxu3 %v372_v13 }
 0x13b   :  { %v374_v18 = vand.u32 4294901760, %v373_v17  ;;  %544 = vmatmul.f32.vlgmr.msra.gmra.mxu0 %v373_v17 }
 0x13d   :  { %588 = vmatmul.f32.vlgmr.msra.gmra.mxu1 %v374_v18  ;;  %v318_v19 = vpop.permute.xlu0 %317  ;;  %v375_v22 = vsub.f32 %v373_v17, %v374_v18 }
 0x13e   :  { %v323_v23 = vsel %vm321_vm1, %v947_v8, %v318_v19 }
 0x13f   :  { %v380_v24 = vand.u32 4294901760, %v323_v23  ;;  %v376_v25 = vand.u32 4294901760, %v375_v22 }
 0x141   :  { %v381_v26 = vsub.f32 %v323_v23, %v380_v24  ;;  %377 = vmatmul.f32.vlgmr.msrb.gmra.mxu2 %v376_v25  ;;  %490 = vmatmul.f32.gmra.mxu3 %v380_v24 }
 0x143   :  { %549 = vmatmul.f32.gmra.mxu0 %v381_v26  ;;  %v382_v27 = vand.u32 4294901760, %v381_v26 }
 0x145   :  { %594 = vmatmul.f32.gmra.mxu1 %v382_v27  ;;  %v383_v28 = vsub.f32 %v381_v26, %v382_v27 }
 0x147   :  { %v384_v29 = vand.u32 4294901760, %v383_v28 }
 0x149   :  { %385 = vmatmul.f32.gmra.mxu2 %v384_v29  ;;  %704 = vmatmul.f32.vlgmr.msra.gmra.mxu3 %v372_v13 }
 0x151   :  { %663 = vmatmul.f32.vlgmr.msra.gmra.mxu2 %v372_v13  ;;  %708 = vmatmul.f32.gmra.mxu3 %v380_v24 }
 0x159   :  { %667 = vmatmul.f32.gmra.mxu2 %v380_v24 }
 0x1b8   :  { %v545_v35 = vpop.f32.mrf.mxu0 }
 0x1ba   :  { %v589_v42 = vpop.f32.mrf.mxu1 }
 0x1bc   :  { %v487_v31 = vpop.f32.mrf.mxu3 }
 0x1c0   :  { %v550_v61 = vpop.f32.mrf.mxu0 }
 0x1c2   :  { %v595_v6 = vpop.f32.mrf.mxu1 }
 0x1c4   :  { %v378_v32 = vpop.f32.mrf.mxu2  ;;  %v491_v33 = vpop.f32.mrf.mxu3 }
 0x1c5   :  { %v488_v34 = vadd.f32 %v487_v31, %v378_v32 }
 0x1c7   :  { %v546_v37 = vadd.f32 %v545_v35, %v488_v34 }
 0x1c9   :  { %v590_v54 = vadd.f32 %v589_v42, %v546_v37 }
 0x1cc   :  { %v386_v36 = vpop.f32.mrf.mxu2  ;;  %v705_v57 = vpop.f32.mrf.mxu3 }
 0x1cd   :  { %v492_v43 = vadd.f32 %v491_v33, %v386_v36 }
 0x1cf   :  { %v551_v2 = vadd.f32 %v550_v61, %v492_v43 }
 0x1d1   :  { %v596_v8 = vadd.f32 %v595_v6, %v551_v2 }
 0x1d4   :  { %v664_v58 = vpop.f32.mrf.mxu2  ;;  %v709_v20 = vpop.f32.mrf.mxu3 }
 0x1d5   :  { %v665_v59 = vadd.f32 %v664_v58, %v590_v54 }
 0x1d7   :  { %v706_v3 = vadd.f32 %v705_v57, %v665_v59 }
 0x1d9   :  { %712 = vst.msk [vmem:[%s1114_s3] sm:$0xff] %vm321_vm1, %v706_v3 }
 0x1dc   :  { %v668_v15 = vpop.f32.mrf.mxu2 }
 0x1dd   :  { %v669_v16 = vadd.f32 %v668_v15, %v596_v8 }
 0x1df   :  { %v710_v40 = vadd.f32 %v709_v20, %v669_v16 }
 0x1e1   :  { %713 = vst.msk [vmem:[%s1114_s3 + $0x8] sm:$0xff] %vm321_vm1, %v710_v40 }

</bundles_post_ra>
